<compile_context>
chip_gen: v5e
topology: v5e:2x2
jax: 0.10.0
libtpu: 0.0.40
codegen_flags: <defaults>
</compile_context>

<pallas_src>
import functools

import jax
import jax.numpy as jnp
from jax import lax
from jax.experimental import pallas as pl
from jax.experimental.pallas import tpu as pltpu


def _build_rotation_matrix(bivector_coeffs, dim):
    """Compose the sequential Givens rotations into a single (dim, dim) matrix.

    Matches the PyTorch loop order exactly: pairs = [(i, j) for i in range(dim)
    for j in range(i+1, dim)], applied in that order.  Each rotation only
    touches rows i and j of the running matrix, so we scan 2-row updates
    instead of tracing K dense (dim, dim) matmuls.
    """
    pairs = [(i, j) for i in range(dim) for j in range(i + 1, dim)]
    ii = jnp.array([p[0] for p in pairs], dtype=jnp.int32)
    jj = jnp.array([p[1] for p in pairs], dtype=jnp.int32)
    c = jnp.cos(bivector_coeffs.astype(jnp.float32))
    s = jnp.sin(bivector_coeffs.astype(jnp.float32))

    def step(R, inp):
        i, j, ci, si = inp
        ri = R[i]
        rj = R[j]
        R = R.at[i].set(ci * ri - si * rj)
        R = R.at[j].set(si * ri + ci * rj)
        return R, None

    R0 = jnp.eye(dim, dtype=jnp.float32)
    R, _ = lax.scan(step, R0, (ii, jj, c, s))
    return R  # column-vector convention: y = R @ x  =>  rows: y = x @ R^T


def _clifford_kernel(x_ref, kT_ref, b_ref, o_ref):
    # y = x_packed @ kron(I_pack, R^T) + bias_packed
    # matmul on the MXU (full 128-wide contraction), bias add on the VPU,
    # unmasked 128-lane stores.
    y = jnp.dot(x_ref[...], kT_ref[...], preferred_element_type=jnp.float32)
    o_ref[...] = (y + b_ref[...]).astype(o_ref.dtype)


@functools.partial(jax.jit, static_argnames=("tile_m",))
def clifford_linear(x, bivector_coeffs, bias, *, tile_m=2048):
    """Pallas implementation of CliffordLinear.forward.

    x: (..., dim) float32
    bivector_coeffs: (dim*(dim-1)//2,) float32
    bias: (dim,) float32
    tile_m: packed-row tile size (rows of width pack*dim).  2048 -> 1 MiB per
            x/out block, ~4 MiB total double-buffered; fits default scoped
            VMEM on v5e/v6e/v7x with plenty of headroom.
    """
    dim = x.shape[-1]
    orig_shape = x.shape
    xf = x.reshape(-1, dim).astype(jnp.float32)
    N = xf.shape[0]

    # Pack enough `dim`-wide rows side by side to fill (at least) 128 lanes.
    pack = max(1, pl.cdiv(128, dim))          # 16 for dim=8 -> width 128
    width = pack * dim

    # Tiny pad (< pack rows) so rows repack evenly; no full tile_m-sized copy.
    pad = (-N) % pack
    if pad:
        xf = jnp.concatenate([xf, jnp.zeros((pad, dim), jnp.float32)], axis=0)
    Np = N + pad
    rows = Np // pack
    xp = xf.reshape(rows, width)

    # Resident operands: block-diagonal rotation and lane-tiled bias.
    R = _build_rotation_matrix(bivector_coeffs, dim)                    # (dim, dim)
    kT = jnp.kron(jnp.eye(pack, dtype=jnp.float32), R.T)                # (width, width)
    bp = jnp.tile(bias.astype(jnp.float32).reshape(1, dim), (1, pack))  # (1, width)

    # Tile size: full array if small, else a multiple of 8 sublanes; the
    # ragged last grid block (if any) is masked by Pallas.
    tm = min(tile_m, rows)
    if tm < rows:
        tm = max(8, (tm // 8) * 8)
    grid = (pl.cdiv(rows, tm),)

    cost = pl.CostEstimate(
        flops=2 * rows * width * width,
        transcendentals=0,
        bytes_accessed=2 * rows * width * 4 + width * width * 4 + width * 4,
    )

    out = pl.pallas_call(
        _clifford_kernel,
        out_shape=jax.ShapeDtypeStruct((rows, width), jnp.float32),
        grid=grid,
        in_specs=[
            pl.BlockSpec((tm, width), lambda i: (i, 0)),       # packed x tile
            pl.BlockSpec((width, width), lambda i: (0, 0)),    # kron(I, R^T), resident
            pl.BlockSpec((1, width), lambda i: (0, 0)),        # packed bias, resident
        ],
        out_specs=pl.BlockSpec((tm, width), lambda i: (i, 0)),
        compiler_params=pltpu.CompilerParams(
            dimension_semantics=("parallel",),   # shards across TCs on v7x
        ),
        cost_estimate=cost,
    )(xp, kT, bp)

    out = out.reshape(Np, dim)
    if pad:
        out = out[:N]
    return out.reshape(orig_shape)


def _reference_clifford(x, bivector_coeffs, bias, dim):
    """Pure-JAX transcription of the PyTorch forward (sequential rotations)."""
    pairs = [(i, j) for i in range(dim) for j in range(i + 1, dim)]
    cos_vals = jnp.cos(bivector_coeffs)
    sin_vals = jnp.sin(bivector_coeffs)
    out = x.astype(jnp.float32)
    for idx, (i, j) in enumerate(pairs):
        c, s = cos_vals[idx], sin_vals[idx]
        xi = out[..., i]
        xj = out[..., j]
        out = out.at[..., i].set(c * xi - s * xj)
        out = out.at[..., j].set(s * xi + c * xj)
    return out + bias


if __name__ == "__main__":
    dim = 8
    batch, seq = 4, 32          # flattened N = 128 rows -> 8 packed rows of 128 lanes
    n_pairs = dim * (dim - 1) // 2

    key = jax.random.PRNGKey(0)
    k_x, k_coeff = jax.random.split(key)

    x = jax.random.normal(k_x, (batch, seq, dim), dtype=jnp.float32)
    bivector_coeffs = jax.random.normal(k_coeff, (n_pairs,), dtype=jnp.float32) * 0.01
    bias = jnp.zeros((dim,), dtype=jnp.float32)

    y = clifford_linear(x, bivector_coeffs, bias)
    y = jax.block_until_ready(y)

    # Correctness check against a direct transcription of the PyTorch loop.
    y_ref = _reference_clifford(x, bivector_coeffs, bias, dim)
    assert y.shape == x.shape
    assert jnp.allclose(y, y_ref, atol=1e-5, rtol=1e-5), "mismatch vs reference"

    print("KERNEL_OK")
</pallas_src>

<mosaic_0001>
module attributes {stable_mosaic.version = 11 : i64} {
  func.func @_clifford_kernel(%arg0: i32, %arg1: memref<8x128xf32, #tpu.memory_space<vmem>>, %arg2: memref<128x128xf32, #tpu.memory_space<vmem>>, %arg3: memref<1x128xf32, #tpu.memory_space<vmem>>, %arg4: memref<8x128xf32, #tpu.memory_space<vmem>>) attributes {dimension_semantics = [#tpu.dimension_semantics<parallel>], iteration_bounds = array<i64: 1>, scalar_prefetch = 0 : i64, scratch_operands = 0 : i64, tpu.core_type = #tpu.core_type<tc>, window_params = [{transform_indices = @transform_0, window_bounds = array<i64: 8, 128>}, {pipeline_mode = #tpu.pipeline_mode<synchronous>, transform_indices = @transform_1, window_bounds = array<i64: 128, 128>}, {pipeline_mode = #tpu.pipeline_mode<synchronous>, transform_indices = @transform_2, window_bounds = array<i64: 1, 128>}, {transform_indices = @transform_3, window_bounds = array<i64: 8, 128>}]} {
    %c0 = arith.constant 0 : index
    %c0_0 = arith.constant 0 : index
    %0 = vector.load %arg1[%c0, %c0_0] : memref<8x128xf32, #tpu.memory_space<vmem>>, vector<8x128xf32>
    %c0_1 = arith.constant 0 : index
    %c0_2 = arith.constant 0 : index
    %1 = vector.load %arg2[%c0_1, %c0_2] : memref<128x128xf32, #tpu.memory_space<vmem>>, vector<128x128xf32>
    %cst = arith.constant dense<0.000000e+00> : vector<8x128xf32>
    %2 = tpu.matmul %0, %1, %cst {dimension_numbers = #tpu.dot_dimension_numbers<[1], [0], [0], [1], [0, 0, 1, 1], [], []>} : vector<8x128xf32>, vector<128x128xf32>, vector<8x128xf32> -> vector<8x128xf32>
    %c0_3 = arith.constant 0 : index
    %c0_4 = arith.constant 0 : index
    %3 = vector.load %arg3[%c0_3, %c0_4] : memref<1x128xf32, #tpu.memory_space<vmem>>, vector<1x128xf32>
    %4 = vector.broadcast %3 : vector<1x128xf32> to vector<8x128xf32>
    %5 = arith.addf %2, %4 : vector<8x128xf32>
    %c0_5 = arith.constant 0 : index
    %c0_6 = arith.constant 0 : index
    %6 = vector.load %arg4[%c0_5, %c0_6] : memref<8x128xf32, #tpu.memory_space<vmem>>, vector<8x128xf32>
    tpu.vector_store %arg4[%c0_5, %c0_6], %5 {strides = array<i32>} : memref<8x128xf32, #tpu.memory_space<vmem>>, vector<8x128xf32>,
    return
  }
  func.func @transform_0(%arg0: i32) -> (i32, i32) {
    %c0_i32 = arith.constant 0 : i32
    %c0_i32_0 = arith.constant 0 : i32
    return %arg0, %c0_i32 : i32, i32
  }
  func.func @transform_1(%arg0: i32) -> (i32, i32) {
    %c0_i32 = arith.constant 0 : i32
    %c0_i32_0 = arith.constant 0 : i32
    %c0_i32_1 = arith.constant 0 : i32
    return %c0_i32, %c0_i32_0 : i32, i32
  }
  func.func @transform_2(%arg0: i32) -> (i32, i32) {
    %c0_i32 = arith.constant 0 : i32
    %c0_i32_0 = arith.constant 0 : i32
    %c0_i32_1 = arith.constant 0 : i32
    return %c0_i32, %c0_i32_0 : i32, i32
  }
  func.func @transform_3(%arg0: i32) -> (i32, i32) {
    %c0_i32 = arith.constant 0 : i32
    %c0_i32_0 = arith.constant 0 : i32
    return %arg0, %c0_i32 : i32, i32
  }
}

</mosaic_0001>

<bundles_post_ra>
// kernel: clifford_linear.1
= control target key start
LH: loop header
LB: loop body
LE: loop exit
PB: predicated region body
PF: predicated region fallthrough
CT: control target
= control target key end

     0   :  { %s138_s1 = inlined_call_operand.vmem [shape: f32[128,128], index: 1, kind: input, shape index: {}]   ;;  %s139_s2 = inlined_call_operand.vmem [shape: f32[1,128], index: 2, kind: input, shape index: {}]   ;;  %s140_s0 = inlined_call_operand.vmem [shape: f32[8,128], index: 0, kind: input, shape index: {}]   ;;  %s141_s3 = inlined_call_operand.vmem [shape: f32[8,128], index: 3, kind: output, shape index: {}]  }
   0x1   :  { %v30_v0 = vld [vmem:[%s138_s1 + $0x78] sm:$0xff]  ;;  %v29_v1 = vld [vmem:[%s138_s1 + $0x70] sm:$0xff]  ;;  %v28_v2 = vld [vmem:[%s138_s1 + $0x68] sm:$0xff] }
   0x2   :  { %35 = vmatpush.msra.mxu0 %v30_v0  ;;  %v27_v3 = vld [vmem:[%s138_s1 + $0x60] sm:$0xff]  ;;  %v26_v4 = vld [vmem:[%s138_s1 + $0x58] sm:$0xff]  ;;  %v25_v5 = vld [vmem:[%s138_s1 + $0x50] sm:$0xff] }
   0x3   :  { %v24_v6 = vld [vmem:[%s138_s1 + $0x48] sm:$0xff]  ;;  %v23_v7 = vld [vmem:[%s138_s1 + $0x40] sm:$0xff]  ;;  %v22_v8 = vld [vmem:[%s138_s1 + $0x38] sm:$0xff] }
   0x4   :  { %36 = vmatpush.msra.mxu0 %v29_v1  ;;  %v21_v9 = vld [vmem:[%s138_s1 + $0x30] sm:$0xff]  ;;  %v20_v10 = vld [vmem:[%s138_s1 + $0x28] sm:$0xff]  ;;  %v19_v11 = vld [vmem:[%s138_s1 + $0x20] sm:$0xff] }
   0x5   :  { %v18_v12 = vld [vmem:[%s138_s1 + $0x18] sm:$0xff]  ;;  %v17_v13 = vld [vmem:[%s138_s1 + $0x10] sm:$0xff]  ;;  %v16_v14 = vld [vmem:[%s138_s1 + $0x8] sm:$0xff] }
   0x6   :  { %37 = vmatpush.msra.mxu0 %v28_v2  ;;  %v15_v15 = vld [vmem:[%s138_s1] sm:$0xff] }
   0x7   :  { %v14_v16 = vld [vmem:[%s140_s0] sm:$0xff] }
   0x8   :  { %38 = vmatpush.msra.mxu0 %v27_v3  ;;  %v60_v17 = vld [vmem:[%s139_s2] ss:$0 sm:$0xff] }
   0xa   :  { %39 = vmatpush.msra.mxu0 %v26_v4 }
   0xc   :  { %40 = vmatpush.msra.mxu0 %v25_v5 }
   0xe   :  { %41 = vmatpush.msra.mxu0 %v24_v6 }
  0x10   :  { %42 = vmatpush.msra.mxu0 %v23_v7 }
  0x12   :  { %43 = vmatpush.msra.mxu0 %v22_v8 }
  0x14   :  { %44 = vmatpush.msra.mxu0 %v21_v9 }
  0x16   :  { %45 = vmatpush.msra.mxu0 %v20_v10 }
  0x18   :  { %46 = vmatpush.msra.mxu0 %v19_v11 }
  0x1a   :  { %47 = vmatpush.msra.mxu0 %v18_v12 }
  0x1c   :  { %48 = vmatpush.msra.mxu0 %v17_v13 }
  0x1e   :  { %49 = vmatpush.msra.mxu0 %v16_v14 }
  0x20   :  { %50 = vmatpush.msra.mxu0 %v15_v15 }
  0x21   :  { %51 = vmatmul.f32.vlgmr.msra.gmra.mxu0 %v14_v16 }
  0x9e   :  { %v52_v18 = vpop.f32.mrf.mxu0 }
  0x9f   :  { %v53_v19 = vadd.f32 %v60_v17, %v52_v18 }
  0xa1   :  { %55 = vst [vmem:[%s141_s3] sm:$0xff] %v53_v19 }

</bundles_post_ra>
